<compile_context>
chip_gen: v5e
topology: v5e:2x2
jax: 0.10.0
libtpu: 0.0.40
codegen_flags: <defaults>
</compile_context>

<pallas_src>
import math

import jax
import jax.numpy as jnp
from jax.experimental import pallas as pl
from jax.experimental.pallas import tpu as pltpu

# ---- model hyper-params (small, synthetic) ----
B = 2          # batch (number of prompts)
L = 8          # context length (seq)
D = 32         # transformer width
H = 4          # attention heads
DH = D // H    # head dim
LAYERS = 2     # transformer depth
P = 32         # text projection dim
EPS = 1e-5
NEG_INF = -1e9


def _layernorm(x, w, b):
    mu = jnp.mean(x, axis=-1, keepdims=True)
    var = jnp.mean((x - mu) ** 2, axis=-1, keepdims=True)
    return (x - mu) * jax.lax.rsqrt(var + EPS) * w + b


# ------------------------------------------------------------------ fused kernel
def text_encoder_kernel(eot_ref,                       # SMEM scalar-prefetch: (B,) int32
                        x_ref, pos_ref,
                        ln1w_ref, ln1b_ref, wqkv_ref, bqkv_ref, wo_ref, bo_ref,
                        ln2w_ref, ln2b_ref, w1_ref, b1_ref, w2_ref, b2_ref,
                        lnfw_ref, lnfb_ref, proj_ref,
                        o_ref,
                        acc_ref):
    b = pl.program_id(0)       # prompt index   (parallel)
    l = pl.program_id(1)       # layer index    (arbitrary / sequential)

    # ---- layer 0: initialize the per-prompt residual stream ----
    @pl.when(l == 0)
    def _():
        acc_ref[...] = x_ref[0] + pos_ref[...]          # (L, D) f32

    x = acc_ref[...]                                    # (L, D) f32 residual stream

    # per-prompt causal additive mask, recomputed in-kernel (cheap VPU work)
    qi = jax.lax.broadcasted_iota(jnp.int32, (L, L), 0)
    ki = jax.lax.broadcasted_iota(jnp.int32, (L, L), 1)
    mask = jnp.where(ki <= qi, 0.0, NEG_INF).astype(jnp.float32)

    # ---- multi-head causal self-attention branch ----
    xn = _layernorm(x, ln1w_ref[0], ln1b_ref[0])
    qkv = jnp.dot(xn.astype(jnp.bfloat16), wqkv_ref[0],            # one (L,D)@(D,3D)
                  preferred_element_type=jnp.float32) + bqkv_ref[0]  # (L, 3D), Q pre-scaled
    q = jnp.stack([qkv[:, h * DH:(h + 1) * DH] for h in range(H)], axis=0)          # (H,L,DH)
    k = jnp.stack([qkv[:, D + h * DH:D + (h + 1) * DH] for h in range(H)], axis=0)
    v = jnp.stack([qkv[:, 2 * D + h * DH:2 * D + (h + 1) * DH] for h in range(H)], axis=0)

    s = jnp.einsum("hqe,hke->hqk", q, k,
                   preferred_element_type=jnp.float32) + mask       # (H, L, L)
    s = s - jnp.max(s, axis=-1, keepdims=True)
    p = jnp.exp(s)
    p = p * pl.reciprocal(jnp.sum(p, axis=-1, keepdims=True), approx=True)
    o = jnp.einsum("hqk,hke->hqe", p, v,
                   preferred_element_type=jnp.float32)              # (H, L, DH)

    # single output projection: concat heads along lanes, one (L,D)@(D,D) matmul
    o_cat = jnp.concatenate([o[h] for h in range(H)], axis=-1)      # (L, D)
    x = x + jnp.dot(o_cat.astype(jnp.bfloat16), wo_ref[0],
                    preferred_element_type=jnp.float32) + bo_ref[0]

    # ---- MLP branch (QuickGELU, as in CLIP) ----
    xn = _layernorm(x, ln2w_ref[0], ln2b_ref[0])
    hdn = jnp.dot(xn.astype(jnp.bfloat16), w1_ref[0],
                  preferred_element_type=jnp.float32) + b1_ref[0]
    hdn = hdn * jax.nn.sigmoid(1.702 * hdn)
    x = x + jnp.dot(hdn.astype(jnp.bfloat16), w2_ref[0],
                    preferred_element_type=jnp.float32) + b2_ref[0]

    acc_ref[...] = x

    # ---- last layer: EOT gather (one-hot matmul) + ln_final + text projection ----
    @pl.when(l == LAYERS - 1)
    def _():
        eot = eot_ref[b]
        col = jax.lax.broadcasted_iota(jnp.int32, (1, L), 1)
        onehot = (col == eot).astype(jnp.float32)                   # (1, L)
        row = jnp.dot(onehot, x, preferred_element_type=jnp.float32)  # (1, D)
        xf = _layernorm(row, lnfw_ref[...], lnfb_ref[...])
        o_ref[0] = jnp.dot(xf.astype(jnp.bfloat16), proj_ref[...],
                           preferred_element_type=jnp.float32)      # (1, P)


# ------------------------------------------------------------------ wrapper
def _shared_spec(shape):
    zeros = (0,) * len(shape)
    return pl.BlockSpec(tuple(shape), lambda b, l, eot, _z=zeros: _z)


def _layer_spec(shape):
    # per-layer block of a (LAYERS, ...) stacked weight; indexed by the layer grid axis
    zeros = (0,) * (len(shape) - 1)
    return pl.BlockSpec((1,) + tuple(shape[1:]),
                        lambda b, l, eot, _z=zeros: (l,) + _z)


@jax.jit
def text_encoder_forward(kparams, prompts, tokenized_prompts):
    eot = jnp.argmax(tokenized_prompts, axis=-1).astype(jnp.int32)

    inputs = (prompts,                          # (B, L, D)
              kparams["pos"],                   # (L, D)
              kparams["ln1_w"], kparams["ln1_b"],
              kparams["wqkv"], kparams["bqkv"],
              kparams["wo"], kparams["bo"],
              kparams["ln2_w"], kparams["ln2_b"],
              kparams["w1"], kparams["b1"], kparams["w2"], kparams["b2"],
              kparams["lnf_w"], kparams["lnf_b"], kparams["proj"])

    in_specs = [
        pl.BlockSpec((1, L, D), lambda b, l, eot: (b, 0, 0)),     # prompts (per prompt)
        _shared_spec((L, D)),                                     # pos
        _layer_spec((LAYERS, 1, D)), _layer_spec((LAYERS, 1, D)),         # ln1 w/b
        _layer_spec((LAYERS, D, 3 * D)), _layer_spec((LAYERS, 1, 3 * D)),  # wqkv/bqkv
        _layer_spec((LAYERS, D, D)), _layer_spec((LAYERS, 1, D)),          # wo/bo
        _layer_spec((LAYERS, 1, D)), _layer_spec((LAYERS, 1, D)),          # ln2 w/b
        _layer_spec((LAYERS, D, 4 * D)), _layer_spec((LAYERS, 1, 4 * D)),  # w1/b1
        _layer_spec((LAYERS, 4 * D, D)), _layer_spec((LAYERS, 1, D)),      # w2/b2
        _shared_spec((1, D)), _shared_spec((1, D)),               # ln_final w/b
        _shared_spec((D, P)),                                     # text projection
    ]

    grid_spec = pltpu.PrefetchScalarGridSpec(
        num_scalar_prefetch=1,                 # eot indices -> SMEM
        grid=(B, LAYERS),                      # prompts parallel, layers sequential
        in_specs=in_specs,
        out_specs=pl.BlockSpec((1, 1, P), lambda b, l, eot: (b, 0, 0)),
        scratch_shapes=[pltpu.VMEM((L, D), jnp.float32)],   # per-prompt residual stream
    )
    out = pl.pallas_call(
        text_encoder_kernel,
        out_shape=jax.ShapeDtypeStruct((B, 1, P), jnp.float32),
        grid_spec=grid_spec,
        compiler_params=pltpu.CompilerParams(
            dimension_semantics=("parallel", "arbitrary")),
        # NOTE: set vmem_limit_bytes here when scaling to real CLIP sizes.
    )(eot, *inputs)
    return out.reshape(B, P)


# ------------------------------------------------------------------ param prep (kernel layout)
def prepare_kernel_params(params):
    scale = 1.0 / math.sqrt(DH)

    def stack(name):
        return jnp.stack([lp[name] for lp in params["layers"]])

    wqkv = stack("wqkv")                               # (LAYERS, D, 3D)
    bqkv = stack("bqkv")                               # (LAYERS, 1, 3D)
    # fold 1/sqrt(DH) into the Q columns of the fused QKV weight & bias
    col_scale = jnp.concatenate(
        [jnp.full((D,), scale, jnp.float32), jnp.ones((2 * D,), jnp.float32)])
    wqkv = wqkv * col_scale
    bqkv = bqkv * col_scale

    return dict(
        pos=params["pos"],                             # (L, D) — added in-kernel
        ln1_w=stack("ln1_w"), ln1_b=stack("ln1_b"),
        wqkv=wqkv.astype(jnp.bfloat16), bqkv=bqkv,
        wo=stack("wo").astype(jnp.bfloat16), bo=stack("bo"),
        ln2_w=stack("ln2_w"), ln2_b=stack("ln2_b"),
        w1=stack("w1").astype(jnp.bfloat16), b1=stack("b1"),
        w2=stack("w2").astype(jnp.bfloat16), b2=stack("b2"),
        lnf_w=params["ln_w"], lnf_b=params["ln_b"],
        proj=params["proj"].astype(jnp.bfloat16),
    )


# ------------------------------------------------------------------ reference (pure JAX, f32)
def reference_forward(params, prompts, tokenized_prompts):
    x = prompts + params["pos"]
    for lp in params["layers"]:
        xn = _layernorm(x, lp["ln1_w"], lp["ln1_b"])
        qkv = xn @ lp["wqkv"] + lp["bqkv"]
        q = qkv[..., :D].reshape(B, L, H, DH)
        k = qkv[..., D:2 * D].reshape(B, L, H, DH)
        v = qkv[..., 2 * D:].reshape(B, L, H, DH)
        s = jnp.einsum("bqhd,bkhd->bhqk", q, k) / jnp.sqrt(jnp.float32(DH))
        s = s + params["mask"][None, None]
        p = jax.nn.softmax(s, axis=-1)
        a = jnp.einsum("bhqk,bkhd->bqhd", p, v).reshape(B, L, D)
        x = x + a @ lp["wo"] + lp["bo"]
        xn = _layernorm(x, lp["ln2_w"], lp["ln2_b"])
        h = xn @ lp["w1"] + lp["b1"]
        h = h * jax.nn.sigmoid(1.702 * h)
        x = x + h @ lp["w2"] + lp["b2"]
    x = _layernorm(x, params["ln_w"], params["ln_b"])
    eot = jnp.argmax(tokenized_prompts, axis=-1)
    return x[jnp.arange(B), eot] @ params["proj"]


# ------------------------------------------------------------------ params & main
def init_params(key):
    def nrm(k, shape, scale=0.02):
        return scale * jax.random.normal(k, shape, dtype=jnp.float32)

    keys = jax.random.split(key, 3 + LAYERS * 6)
    layers = []
    for i in range(LAYERS):
        k = jax.random.split(keys[3 + i], 6)
        layers.append(dict(
            ln1_w=jnp.ones((1, D), jnp.float32), ln1_b=jnp.zeros((1, D), jnp.float32),
            wqkv=nrm(k[0], (D, 3 * D)), bqkv=jnp.zeros((1, 3 * D), jnp.float32),
            wo=nrm(k[1], (D, D)), bo=jnp.zeros((1, D), jnp.float32),
            ln2_w=jnp.ones((1, D), jnp.float32), ln2_b=jnp.zeros((1, D), jnp.float32),
            w1=nrm(k[2], (D, 4 * D)), b1=jnp.zeros((1, 4 * D), jnp.float32),
            w2=nrm(k[3], (4 * D, D)), b2=jnp.zeros((1, D), jnp.float32),
        ))
    # per-prompt causal additive mask (reference uses this (L, L) form)
    mask = jnp.triu(jnp.full((L, L), NEG_INF, jnp.float32), k=1)
    return dict(
        pos=nrm(keys[0], (L, D)),
        layers=layers,
        ln_w=jnp.ones((1, D), jnp.float32), ln_b=jnp.zeros((1, D), jnp.float32),
        proj=nrm(keys[1], (D, P)),
        mask=mask,
    )


if __name__ == "__main__":
    key = jax.random.PRNGKey(0)
    kp, kx, kt = jax.random.split(key, 3)
    params = init_params(kp)
    kparams = prepare_kernel_params(params)

    prompts = 0.02 * jax.random.normal(kx, (B, L, D), dtype=jnp.float32)
    # synthetic token ids; EOT (max id) at position 5 for prompt 0 and 7 for prompt 1
    tokenized = jax.random.randint(kt, (B, L), 1, 1000, dtype=jnp.int32)
    tokenized = tokenized.at[0, 5].set(49407).at[1, 7].set(49407)

    out = text_encoder_forward(kparams, prompts, tokenized)
    out = jax.block_until_ready(out)

    ref = reference_forward(params, prompts, tokenized)
    assert out.shape == (B, P)
    err = float(jnp.max(jnp.abs(out - ref)))
    assert jnp.allclose(out, ref, rtol=1e-2, atol=1e-2), err
    print("KERNEL_OK")
</pallas_src>

<mosaic_0001>
module attributes {stable_mosaic.version = 11 : i64} {
  func.func @text_encoder_kernel(%arg0: i32, %arg1: i32, %arg2: memref<2xi32, #tpu.memory_space<smem>>, %arg3: memref<1x8x32xf32, #tpu.memory_space<vmem>>, %arg4: memref<8x32xf32, #tpu.memory_space<vmem>>, %arg5: memref<1x1x32xf32, #tpu.memory_space<vmem>>, %arg6: memref<1x1x32xf32, #tpu.memory_space<vmem>>, %arg7: memref<1x32x96xbf16, #tpu.memory_space<vmem>>, %arg8: memref<1x1x96xf32, #tpu.memory_space<vmem>>, %arg9: memref<1x32x32xbf16, #tpu.memory_space<vmem>>, %arg10: memref<1x1x32xf32, #tpu.memory_space<vmem>>, %arg11: memref<1x1x32xf32, #tpu.memory_space<vmem>>, %arg12: memref<1x1x32xf32, #tpu.memory_space<vmem>>, %arg13: memref<1x32x128xbf16, #tpu.memory_space<vmem>>, %arg14: memref<1x1x128xf32, #tpu.memory_space<vmem>>, %arg15: memref<1x128x32xbf16, #tpu.memory_space<vmem>>, %arg16: memref<1x1x32xf32, #tpu.memory_space<vmem>>, %arg17: memref<1x32xf32, #tpu.memory_space<vmem>>, %arg18: memref<1x32xf32, #tpu.memory_space<vmem>>, %arg19: memref<32x32xbf16, #tpu.memory_space<vmem>>, %arg20: memref<1x1x32xf32, #tpu.memory_space<vmem>>, %arg21: memref<8x32xf32, #tpu.memory_space<vmem>>) attributes {dimension_semantics = [#tpu.dimension_semantics<parallel>, #tpu.dimension_semantics<arbitrary>], iteration_bounds = array<i64: 2, 2>, scalar_prefetch = 1 : i64, scratch_operands = 1 : i64, tpu.core_type = #tpu.core_type<tc>, window_params = [{transform_indices = @transform_0, window_bounds = array<i64: 1, 8, 32>}, {pipeline_mode = #tpu.pipeline_mode<synchronous>, transform_indices = @transform_1, window_bounds = array<i64: 8, 32>}, {transform_indices = @transform_2, window_bounds = array<i64: 1, 1, 32>}, {transform_indices = @transform_3, window_bounds = array<i64: 1, 1, 32>}, {transform_indices = @transform_4, window_bounds = array<i64: 1, 32, 96>}, {transform_indices = @transform_5, window_bounds = array<i64: 1, 1, 96>}, {transform_indices = @transform_6, window_bounds = array<i64: 1, 32, 32>}, {transform_indices = @transform_7, window_bounds = array<i64: 1, 1, 32>}, {transform_indices = @transform_8, window_bounds = array<i64: 1, 1, 32>}, {transform_indices = @transform_9, window_bounds = array<i64: 1, 1, 32>}, {transform_indices = @transform_10, window_bounds = array<i64: 1, 32, 128>}, {transform_indices = @transform_11, window_bounds = array<i64: 1, 1, 128>}, {transform_indices = @transform_12, window_bounds = array<i64: 1, 128, 32>}, {transform_indices = @transform_13, window_bounds = array<i64: 1, 1, 32>}, {pipeline_mode = #tpu.pipeline_mode<synchronous>, transform_indices = @transform_14, window_bounds = array<i64: 1, 32>}, {pipeline_mode = #tpu.pipeline_mode<synchronous>, transform_indices = @transform_15, window_bounds = array<i64: 1, 32>}, {pipeline_mode = #tpu.pipeline_mode<synchronous>, transform_indices = @transform_16, window_bounds = array<i64: 32, 32>}, {transform_indices = @transform_17, window_bounds = array<i64: 1, 1, 32>}]} {
    %c0_i32 = arith.constant 0 : i32
    %0 = arith.cmpi eq, %arg1, %c0_i32 : i32
    %1 = arith.extui %0 : i1 to i32
    %c0_i32_0 = arith.constant 0 : i32
    %2 = arith.cmpi ne, %1, %c0_i32_0 : i32
    scf.if %2 {
      %c0_62 = arith.constant 0 : index
      %c0_63 = arith.constant 0 : index
      %c0_64 = arith.constant 0 : index
      %159 = vector.load %arg3[%c0_62, %c0_63, %c0_64] : memref<1x8x32xf32, #tpu.memory_space<vmem>>, vector<1x8x32xf32>
      %160 = vector.shape_cast %159 : vector<1x8x32xf32> to vector<8x32xf32>
      %c0_65 = arith.constant 0 : index
      %c0_66 = arith.constant 0 : index
      %161 = vector.load %arg4[%c0_65, %c0_66] : memref<8x32xf32, #tpu.memory_space<vmem>>, vector<8x32xf32>
      %162 = arith.addf %160, %161 : vector<8x32xf32>
      %c0_67 = arith.constant 0 : index
      %c0_68 = arith.constant 0 : index
      %163 = vector.load %arg21[%c0_67, %c0_68] : memref<8x32xf32, #tpu.memory_space<vmem>>, vector<8x32xf32>
      tpu.vector_store %arg21[%c0_67, %c0_68], %162 {strides = array<i32>} : memref<8x32xf32, #tpu.memory_space<vmem>>, vector<8x32xf32>,
    } else {
    }
    %c0 = arith.constant 0 : index
    %c0_1 = arith.constant 0 : index
    %3 = vector.load %arg21[%c0, %c0_1] : memref<8x32xf32, #tpu.memory_space<vmem>>, vector<8x32xf32>
    %4 = tpu.iota {dimensions = array<i32: 0>} : vector<8x8xi32>
    %5 = tpu.iota {dimensions = array<i32: 1>} : vector<8x8xi32>
    %6 = arith.cmpi sle, %5, %4 : vector<8x8xi32>
    %cst = arith.constant 0.000000e+00 : f32
    %cst_2 = arith.constant -1.000000e+09 : f32
    %7 = vector.broadcast %cst : f32 to vector<8x8xf32>
    %8 = vector.broadcast %cst_2 : f32 to vector<8x8xf32>
    %9 = arith.select %6, %7, %8 : vector<8x8xi1>, vector<8x8xf32>
    %c0_3 = arith.constant 0 : index
    %c0_4 = arith.constant 0 : index
    %c0_5 = arith.constant 0 : index
    %10 = vector.load %arg5[%c0_3, %c0_4, %c0_5] : memref<1x1x32xf32, #tpu.memory_space<vmem>>, vector<1x1x32xf32>
    %11 = vector.shape_cast %10 : vector<1x1x32xf32> to vector<1x32xf32>
    %c0_6 = arith.constant 0 : index
    %c0_7 = arith.constant 0 : index
    %c0_8 = arith.constant 0 : index
    %12 = vector.load %arg6[%c0_6, %c0_7, %c0_8] : memref<1x1x32xf32, #tpu.memory_space<vmem>>, vector<1x1x32xf32>
    %13 = vector.shape_cast %12 : vector<1x1x32xf32> to vector<1x32xf32>
    %cst_9 = arith.constant dense<0.000000e+00> : vector<8xf32>
    %14 = vector.multi_reduction <add>, %3, %cst_9 [1] : vector<8x32xf32> to vector<8xf32>
    %15 = vector.shape_cast %14 : vector<8xf32> to vector<8x1xf32>
    %cst_10 = arith.constant 3.200000e+01 : f32
    %16 = vector.broadcast %cst_10 : f32 to vector<8x1xf32>
    %17 = arith.divf %15, %16 : vector<8x1xf32>
    %18 = vector.broadcast %17 : vector<8x1xf32> to vector<8x32xf32>
    %19 = arith.subf %3, %18 : vector<8x32xf32>
    %20 = arith.mulf %19, %19 : vector<8x32xf32>
    %cst_11 = arith.constant dense<0.000000e+00> : vector<8xf32>
    %21 = vector.multi_reduction <add>, %20, %cst_11 [1] : vector<8x32xf32> to vector<8xf32>
    %22 = vector.shape_cast %21 : vector<8xf32> to vector<8x1xf32>
    %cst_12 = arith.constant 3.200000e+01 : f32
    %23 = vector.broadcast %cst_12 : f32 to vector<8x1xf32>
    %24 = arith.divf %22, %23 : vector<8x1xf32>
    %25 = vector.broadcast %17 : vector<8x1xf32> to vector<8x32xf32>
    %26 = arith.subf %3, %25 : vector<8x32xf32>
    %cst_13 = arith.constant 9.99999974E-6 : f32
    %27 = vector.broadcast %cst_13 : f32 to vector<8x1xf32>
    %28 = arith.addf %24, %27 : vector<8x1xf32>
    %29 = math.rsqrt %28 : vector<8x1xf32>
    %30 = vector.broadcast %29 : vector<8x1xf32> to vector<8x32xf32>
    %31 = arith.mulf %26, %30 : vector<8x32xf32>
    %32 = vector.broadcast %11 : vector<1x32xf32> to vector<8x32xf32>
    %33 = arith.mulf %31, %32 : vector<8x32xf32>
    %34 = vector.broadcast %13 : vector<1x32xf32> to vector<8x32xf32>
    %35 = arith.addf %33, %34 : vector<8x32xf32>
    %36 = arith.truncf %35 : vector<8x32xf32> to vector<8x32xbf16>
    %c0_14 = arith.constant 0 : index
    %c0_15 = arith.constant 0 : index
    %c0_16 = arith.constant 0 : index
    %37 = vector.load %arg7[%c0_14, %c0_15, %c0_16] : memref<1x32x96xbf16, #tpu.memory_space<vmem>>, vector<1x32x96xbf16>
    %38 = vector.shape_cast %37 : vector<1x32x96xbf16> to vector<32x96xbf16>
    %cst_17 = arith.constant dense<0.000000e+00> : vector<8x96xf32>
    %39 = tpu.matmul %36, %38, %cst_17 {dimension_numbers = #tpu.dot_dimension_numbers<[1], [0], [0], [1], [0, 0, 1, 1], [], []>} : vector<8x32xbf16>, vector<32x96xbf16>, vector<8x96xf32> -> vector<8x96xf32>
    %c0_18 = arith.constant 0 : index
    %c0_19 = arith.constant 0 : index
    %c0_20 = arith.constant 0 : index
    %40 = vector.load %arg8[%c0_18, %c0_19, %c0_20] : memref<1x1x96xf32, #tpu.memory_space<vmem>>, vector<1x1x96xf32>
    %41 = vector.shape_cast %40 : vector<1x1x96xf32> to vector<1x96xf32>
    %42 = vector.broadcast %41 : vector<1x96xf32> to vector<8x96xf32>
    %43 = arith.addf %39, %42 : vector<8x96xf32>
    %44 = vector.extract_strided_slice %43 {offsets = [0, 0], sizes = [8, 8], strides = [1, 1]} : vector<8x96xf32> to vector<8x8xf32>
    %45 = vector.extract_strided_slice %43 {offsets = [0, 8], sizes = [8, 8], strides = [1, 1]} : vector<8x96xf32> to vector<8x8xf32>
    %46 = vector.extract_strided_slice %43 {offsets = [0, 16], sizes = [8, 8], strides = [1, 1]} : vector<8x96xf32> to vector<8x8xf32>
    %47 = vector.extract_strided_slice %43 {offsets = [0, 24], sizes = [8, 8], strides = [1, 1]} : vector<8x96xf32> to vector<8x8xf32>
    %48 = vector.shape_cast %44 : vector<8x8xf32> to vector<1x8x8xf32>
    %49 = vector.shape_cast %45 : vector<8x8xf32> to vector<1x8x8xf32>
    %50 = vector.shape_cast %46 : vector<8x8xf32> to vector<1x8x8xf32>
    %51 = vector.shape_cast %47 : vector<8x8xf32> to vector<1x8x8xf32>
    %52 = tpu.concatenate %48, %49, %50, %51 in 0 : vector<1x8x8xf32>, vector<1x8x8xf32>, vector<1x8x8xf32>, vector<1x8x8xf32> -> vector<4x8x8xf32>
    %53 = vector.extract_strided_slice %43 {offsets = [0, 32], sizes = [8, 8], strides = [1, 1]} : vector<8x96xf32> to vector<8x8xf32>
    %54 = vector.extract_strided_slice %43 {offsets = [0, 40], sizes = [8, 8], strides = [1, 1]} : vector<8x96xf32> to vector<8x8xf32>
    %55 = vector.extract_strided_slice %43 {offsets = [0, 48], sizes = [8, 8], strides = [1, 1]} : vector<8x96xf32> to vector<8x8xf32>
    %56 = vector.extract_strided_slice %43 {offsets = [0, 56], sizes = [8, 8], strides = [1, 1]} : vector<8x96xf32> to vector<8x8xf32>
    %57 = vector.shape_cast %53 : vector<8x8xf32> to vector<1x8x8xf32>
    %58 = vector.shape_cast %54 : vector<8x8xf32> to vector<1x8x8xf32>
    %59 = vector.shape_cast %55 : vector<8x8xf32> to vector<1x8x8xf32>
    %60 = vector.shape_cast %56 : vector<8x8xf32> to vector<1x8x8xf32>
    %61 = tpu.concatenate %57, %58, %59, %60 in 0 : vector<1x8x8xf32>, vector<1x8x8xf32>, vector<1x8x8xf32>, vector<1x8x8xf32> -> vector<4x8x8xf32>
    %62 = vector.extract_strided_slice %43 {offsets = [0, 64], sizes = [8, 8], strides = [1, 1]} : vector<8x96xf32> to vector<8x8xf32>
    %63 = vector.extract_strided_slice %43 {offsets = [0, 72], sizes = [8, 8], strides = [1, 1]} : vector<8x96xf32> to vector<8x8xf32>
    %64 = vector.extract_strided_slice %43 {offsets = [0, 80], sizes = [8, 8], strides = [1, 1]} : vector<8x96xf32> to vector<8x8xf32>
    %65 = vector.extract_strided_slice %43 {offsets = [0, 88], sizes = [8, 8], strides = [1, 1]} : vector<8x96xf32> to vector<8x8xf32>
    %66 = vector.shape_cast %62 : vector<8x8xf32> to vector<1x8x8xf32>
    %67 = vector.shape_cast %63 : vector<8x8xf32> to vector<1x8x8xf32>
    %68 = vector.shape_cast %64 : vector<8x8xf32> to vector<1x8x8xf32>
    %69 = vector.shape_cast %65 : vector<8x8xf32> to vector<1x8x8xf32>
    %70 = tpu.concatenate %66, %67, %68, %69 in 0 : vector<1x8x8xf32>, vector<1x8x8xf32>, vector<1x8x8xf32>, vector<1x8x8xf32> -> vector<4x8x8xf32>
    "tpu.trace_start"() <{level = 10 : i32, message = "hqe,hke->hqk"}> : () -> ()
    %cst_21 = arith.constant dense<0.000000e+00> : vector<4x8x8xf32>
    %71 = tpu.matmul %52, %61, %cst_21 {dimension_numbers = #tpu.dot_dimension_numbers<[2], [2], [1], [1], [0, 0, 0, 1, 1, 1], [0], [0]>} : vector<4x8x8xf32>, vector<4x8x8xf32>, vector<4x8x8xf32> -> vector<4x8x8xf32>
    "tpu.trace_stop"() : () -> ()
    %72 = vector.shape_cast %9 : vector<8x8xf32> to vector<1x8x8xf32>
    %73 = vector.broadcast %72 : vector<1x8x8xf32> to vector<4x8x8xf32>
    %74 = arith.addf %71, %73 : vector<4x8x8xf32>
    %cst_22 = arith.constant dense<0xFF800000> : vector<4x8xf32>
    %75 = vector.multi_reduction <maximumf>, %74, %cst_22 [2] : vector<4x8x8xf32> to vector<4x8xf32>
    %76 = vector.shape_cast %75 : vector<4x8xf32> to vector<4x8x1xf32>
    %77 = vector.broadcast %76 : vector<4x8x1xf32> to vector<4x8x8xf32>
    %78 = arith.subf %74, %77 : vector<4x8x8xf32>
    %79 = math.exp %78 : vector<4x8x8xf32>
    %cst_23 = arith.constant dense<0.000000e+00> : vector<4x8xf32>
    %80 = vector.multi_reduction <add>, %79, %cst_23 [2] : vector<4x8x8xf32> to vector<4x8xf32>
    %81 = vector.shape_cast %80 : vector<4x8xf32> to vector<4x8x1xf32>
    %82 = tpu.reciprocal %81 {approx = true} : vector<4x8x1xf32> -> vector<4x8x1xf32>
    %83 = vector.broadcast %82 : vector<4x8x1xf32> to vector<4x8x8xf32>
    %84 = arith.mulf %79, %83 : vector<4x8x8xf32>
    "tpu.trace_start"() <{level = 10 : i32, message = "hqk,hke->hqe"}> : () -> ()
    %cst_24 = arith.constant dense<0.000000e+00> : vector<4x8x8xf32>
    %85 = tpu.matmul %84, %70, %cst_24 {dimension_numbers = #tpu.dot_dimension_numbers<[2], [1], [1], [2], [0, 0, 0, 1, 1, 2], [0], [0]>} : vector<4x8x8xf32>, vector<4x8x8xf32>, vector<4x8x8xf32> -> vector<4x8x8xf32>
    "tpu.trace_stop"() : () -> ()
    %86 = vector.extract_strided_slice %85 {offsets = [0, 0, 0], sizes = [1, 8, 8], strides = [1, 1, 1]} : vector<4x8x8xf32> to vector<1x8x8xf32>
    %87 = vector.shape_cast %86 : vector<1x8x8xf32> to vector<8x8xf32>
    %88 = vector.extract_strided_slice %85 {offsets = [1, 0, 0], sizes = [1, 8, 8], strides = [1, 1, 1]} : vector<4x8x8xf32> to vector<1x8x8xf32>
    %89 = vector.shape_cast %88 : vector<1x8x8xf32> to vector<8x8xf32>
    %90 = vector.extract_strided_slice %85 {offsets = [2, 0, 0], sizes = [1, 8, 8], strides = [1, 1, 1]} : vector<4x8x8xf32> to vector<1x8x8xf32>
    %91 = vector.shape_cast %90 : vector<1x8x8xf32> to vector<8x8xf32>
    %92 = vector.extract_strided_slice %85 {offsets = [3, 0, 0], sizes = [1, 8, 8], strides = [1, 1, 1]} : vector<4x8x8xf32> to vector<1x8x8xf32>
    %93 = vector.shape_cast %92 : vector<1x8x8xf32> to vector<8x8xf32>
    %94 = tpu.concatenate %87, %89, %91, %93 in 1 : vector<8x8xf32>, vector<8x8xf32>, vector<8x8xf32>, vector<8x8xf32> -> vector<8x32xf32>
    %95 = arith.truncf %94 : vector<8x32xf32> to vector<8x32xbf16>
    %c0_25 = arith.constant 0 : index
    %c0_26 = arith.constant 0 : index
    %c0_27 = arith.constant 0 : index
    %96 = vector.load %arg9[%c0_25, %c0_26, %c0_27] : memref<1x32x32xbf16, #tpu.memory_space<vmem>>, vector<1x32x32xbf16>
    %97 = vector.shape_cast %96 : vector<1x32x32xbf16> to vector<32x32xbf16>
    %cst_28 = arith.constant dense<0.000000e+00> : vector<8x32xf32>
    %98 = tpu.matmul %95, %97, %cst_28 {dimension_numbers = #tpu.dot_dimension_numbers<[1], [0], [0], [1], [0, 0, 1, 1], [], []>} : vector<8x32xbf16>, vector<32x32xbf16>, vector<8x32xf32> -> vector<8x32xf32>
    %99 = arith.addf %3, %98 : vector<8x32xf32>
    %c0_29 = arith.constant 0 : index
    %c0_30 = arith.constant 0 : index
    %c0_31 = arith.constant 0 : index
    %100 = vector.load %arg10[%c0_29, %c0_30, %c0_31] : memref<1x1x32xf32, #tpu.memory_space<vmem>>, vector<1x1x32xf32>
    %101 = vector.shape_cast %100 : vector<1x1x32xf32> to vector<1x32xf32>
    %102 = vector.broadcast %101 : vector<1x32xf32> to vector<8x32xf32>
    %103 = arith.addf %99, %102 : vector<8x32xf32>
    %c0_32 = arith.constant 0 : index
    %c0_33 = arith.constant 0 : index
    %c0_34 = arith.constant 0 : index
    %104 = vector.load %arg11[%c0_32, %c0_33, %c0_34] : memref<1x1x32xf32, #tpu.memory_space<vmem>>, vector<1x1x32xf32>
    %105 = vector.shape_cast %104 : vector<1x1x32xf32> to vector<1x32xf32>
    %c0_35 = arith.constant 0 : index
    %c0_36 = arith.constant 0 : index
    %c0_37 = arith.constant 0 : index
    %106 = vector.load %arg12[%c0_35, %c0_36, %c0_37] : memref<1x1x32xf32, #tpu.memory_space<vmem>>, vector<1x1x32xf32>
    %107 = vector.shape_cast %106 : vector<1x1x32xf32> to vector<1x32xf32>
    %cst_38 = arith.constant dense<0.000000e+00> : vector<8xf32>
    %108 = vector.multi_reduction <add>, %103, %cst_38 [1] : vector<8x32xf32> to vector<8xf32>
    %109 = vector.shape_cast %108 : vector<8xf32> to vector<8x1xf32>
    %cst_39 = arith.constant 3.200000e+01 : f32
    %110 = vector.broadcast %cst_39 : f32 to vector<8x1xf32>
    %111 = arith.divf %109, %110 : vector<8x1xf32>
    %112 = vector.broadcast %111 : vector<8x1xf32> to vector<8x32xf32>
    %113 = arith.subf %103, %112 : vector<8x32xf32>
    %114 = arith.mulf %113, %113 : vector<8x32xf32>
    %cst_40 = arith.constant dense<0.000000e+00> : vector<8xf32>
    %115 = vector.multi_reduction <add>, %114, %cst_40 [1] : vector<8x32xf32> to vector<8xf32>
    %116 = vector.shape_cast %115 : vector<8xf32> to vector<8x1xf32>
    %cst_41 = arith.constant 3.200000e+01 : f32
    %117 = vector.broadcast %cst_41 : f32 to vector<8x1xf32>
    %118 = arith.divf %116, %117 : vector<8x1xf32>
    %119 = vector.broadcast %111 : vector<8x1xf32> to vector<8x32xf32>
    %120 = arith.subf %103, %119 : vector<8x32xf32>
    %cst_42 = arith.constant 9.99999974E-6 : f32
    %121 = vector.broadcast %cst_42 : f32 to vector<8x1xf32>
    %122 = arith.addf %118, %121 : vector<8x1xf32>
    %123 = math.rsqrt %122 : vector<8x1xf32>
    %124 = vector.broadcast %123 : vector<8x1xf32> to vector<8x32xf32>
    %125 = arith.mulf %120, %124 : vector<8x32xf32>
    %126 = vector.broadcast %105 : vector<1x32xf32> to vector<8x32xf32>
    %127 = arith.mulf %125, %126 : vector<8x32xf32>
    %128 = vector.broadcast %107 : vector<1x32xf32> to vector<8x32xf32>
    %129 = arith.addf %127, %128 : vector<8x32xf32>
    %130 = arith.truncf %129 : vector<8x32xf32> to vector<8x32xbf16>
    %c0_43 = arith.constant 0 : index
    %c0_44 = arith.constant 0 : index
    %c0_45 = arith.constant 0 : index
    %131 = vector.load %arg13[%c0_43, %c0_44, %c0_45] : memref<1x32x128xbf16, #tpu.memory_space<vmem>>, vector<1x32x128xbf16>
    %132 = vector.shape_cast %131 : vector<1x32x128xbf16> to vector<32x128xbf16>
    %cst_46 = arith.constant dense<0.000000e+00> : vector<8x128xf32>
    %133 = tpu.matmul %130, %132, %cst_46 {dimension_numbers = #tpu.dot_dimension_numbers<[1], [0], [0], [1], [0, 0, 1, 1], [], []>} : vector<8x32xbf16>, vector<32x128xbf16>, vector<8x128xf32> -> vector<8x128xf32>
    %c0_47 = arith.constant 0 : index
    %c0_48 = arith.constant 0 : index
    %c0_49 = arith.constant 0 : index
    %134 = vector.load %arg14[%c0_47, %c0_48, %c0_49] : memref<1x1x128xf32, #tpu.memory_space<vmem>>, vector<1x1x128xf32>
    %135 = vector.shape_cast %134 : vector<1x1x128xf32> to vector<1x128xf32>
    %136 = vector.broadcast %135 : vector<1x128xf32> to vector<8x128xf32>
    %137 = arith.addf %133, %136 : vector<8x128xf32>
    %cst_50 = arith.constant 1.702000e+00 : f32
    %138 = vector.broadcast %cst_50 : f32 to vector<8x128xf32>
    %139 = arith.mulf %138, %137 : vector<8x128xf32>
    %140 = arith.negf %139 : vector<8x128xf32>
    %141 = math.exp %140 : vector<8x128xf32>
    %cst_51 = arith.constant 1.000000e+00 : f32
    %142 = vector.broadcast %cst_51 : f32 to vector<8x128xf32>
    %143 = arith.addf %142, %141 : vector<8x128xf32>
    %144 = arith.divf %142, %143 : vector<8x128xf32>
    %145 = arith.mulf %137, %144 : vector<8x128xf32>
    %146 = arith.truncf %145 : vector<8x128xf32> to vector<8x128xbf16>
    %c0_52 = arith.constant 0 : index
    %c0_53 = arith.constant 0 : index
    %c0_54 = arith.constant 0 : index
    %147 = vector.load %arg15[%c0_52, %c0_53, %c0_54] : memref<1x128x32xbf16, #tpu.memory_space<vmem>>, vector<1x128x32xbf16>
    %148 = vector.shape_cast %147 : vector<1x128x32xbf16> to vector<128x32xbf16>
    %cst_55 = arith.constant dense<0.000000e+00> : vector<8x32xf32>
    %149 = tpu.matmul %146, %148, %cst_55 {dimension_numbers = #tpu.dot_dimension_numbers<[1], [0], [0], [1], [0, 0, 1, 1], [], []>} : vector<8x128xbf16>, vector<128x32xbf16>, vector<8x32xf32> -> vector<8x32xf32>
    %150 = arith.addf %103, %149 : vector<8x32xf32>
    %c0_56 = arith.constant 0 : index
    %c0_57 = arith.constant 0 : index
    %c0_58 = arith.constant 0 : index
    %151 = vector.load %arg16[%c0_56, %c0_57, %c0_58] : memref<1x1x32xf32, #tpu.memory_space<vmem>>, vector<1x1x32xf32>
    %152 = vector.shape_cast %151 : vector<1x1x32xf32> to vector<1x32xf32>
    %153 = vector.broadcast %152 : vector<1x32xf32> to vector<8x32xf32>
    %154 = arith.addf %150, %153 : vector<8x32xf32>
    %c0_59 = arith.constant 0 : index
    %c0_60 = arith.constant 0 : index
    %155 = vector.load %arg21[%c0_59, %c0_60] : memref<8x32xf32, #tpu.memory_space<vmem>>, vector<8x32xf32>
    tpu.vector_store %arg21[%c0_59, %c0_60], %154 {strides = array<i32>} : memref<8x32xf32, #tpu.memory_space<vmem>>, vector<8x32xf32>,
    %c1_i32 = arith.constant 1 : i32
    %156 = arith.cmpi eq, %arg1, %c1_i32 : i32
    %157 = arith.extui %156 : i1 to i32
    %c0_i32_61 = arith.constant 0 : i32
    %158 = arith.cmpi ne, %157, %c0_i32_61 : i32
    scf.if %158 {
      %159 = arith.index_cast %arg0 : i32 to index
      %160 = memref.load %arg2[%159] : memref<2xi32, #tpu.memory_space<smem>>
      %161 = tpu.iota {dimensions = array<i32: 1>} : vector<1x8xi32>
      %162 = vector.broadcast %160 : i32 to vector<1x8xi32>
      %163 = arith.cmpi eq, %161, %162 : vector<1x8xi32>
      %164 = arith.extui %163 : vector<1x8xi1> to vector<1x8xi32>
      %165 = arith.sitofp %164 : vector<1x8xi32> to vector<1x8xf32>
      %cst_62 = arith.constant dense<0.000000e+00> : vector<1x32xf32>
      %166 = tpu.matmul %165, %154, %cst_62 {dimension_numbers = #tpu.dot_dimension_numbers<[1], [0], [0], [1], [0, 0, 1, 1], [], []>} : vector<1x8xf32>, vector<8x32xf32>, vector<1x32xf32> -> vector<1x32xf32>
      %c0_63 = arith.constant 0 : index
      %c0_64 = arith.constant 0 : index
      %167 = vector.load %arg17[%c0_63, %c0_64] : memref<1x32xf32, #tpu.memory_space<vmem>>, vector<1x32xf32>
      %c0_65 = arith.constant 0 : index
      %c0_66 = arith.constant 0 : index
      %168 = vector.load %arg18[%c0_65, %c0_66] : memref<1x32xf32, #tpu.memory_space<vmem>>, vector<1x32xf32>
      %cst_67 = arith.constant dense<0.000000e+00> : vector<1xf32>
      %169 = vector.multi_reduction <add>, %166, %cst_67 [1] : vector<1x32xf32> to vector<1xf32>
      %170 = vector.shape_cast %169 : vector<1xf32> to vector<1x1xf32>
      %cst_68 = arith.constant 3.200000e+01 : f32
      %171 = vector.broadcast %cst_68 : f32 to vector<1x1xf32>
      %172 = arith.divf %170, %171 : vector<1x1xf32>
      %173 = vector.broadcast %172 : vector<1x1xf32> to vector<1x32xf32>
      %174 = arith.subf %166, %173 : vector<1x32xf32>
      %175 = arith.mulf %174, %174 : vector<1x32xf32>
      %cst_69 = arith.constant dense<0.000000e+00> : vector<1xf32>
      %176 = vector.multi_reduction <add>, %175, %cst_69 [1] : vector<1x32xf32> to vector<1xf32>
      %177 = vector.shape_cast %176 : vector<1xf32> to vector<1x1xf32>
      %cst_70 = arith.constant 3.200000e+01 : f32
      %178 = vector.broadcast %cst_70 : f32 to vector<1x1xf32>
      %179 = arith.divf %177, %178 : vector<1x1xf32>
      %180 = vector.broadcast %172 : vector<1x1xf32> to vector<1x32xf32>
      %181 = arith.subf %166, %180 : vector<1x32xf32>
      %cst_71 = arith.constant 9.99999974E-6 : f32
      %182 = vector.broadcast %cst_71 : f32 to vector<1x1xf32>
      %183 = arith.addf %179, %182 : vector<1x1xf32>
      %184 = math.rsqrt %183 : vector<1x1xf32>
      %185 = vector.broadcast %184 : vector<1x1xf32> to vector<1x32xf32>
      %186 = arith.mulf %181, %185 : vector<1x32xf32>
      %187 = arith.mulf %186, %167 : vector<1x32xf32>
      %188 = arith.addf %187, %168 : vector<1x32xf32>
      %189 = arith.truncf %188 : vector<1x32xf32> to vector<1x32xbf16>
      %c0_72 = arith.constant 0 : index
      %c0_73 = arith.constant 0 : index
      %190 = vector.load %arg19[%c0_72, %c0_73] : memref<32x32xbf16, #tpu.memory_space<vmem>>, vector<32x32xbf16>
      %cst_74 = arith.constant dense<0.000000e+00> : vector<1x32xf32>
      %191 = tpu.matmul %189, %190, %cst_74 {dimension_numbers = #tpu.dot_dimension_numbers<[1], [0], [0], [1], [0, 0, 1, 1], [], []>} : vector<1x32xbf16>, vector<32x32xbf16>, vector<1x32xf32> -> vector<1x32xf32>
      %c0_75 = arith.constant 0 : index
      %c0_76 = arith.constant 0 : index
      %c0_77 = arith.constant 0 : index
      %192 = vector.load %arg20[%c0_75, %c0_76, %c0_77] : memref<1x1x32xf32, #tpu.memory_space<vmem>>, vector<1x1x32xf32>
      %193 = vector.shape_cast %192 : vector<1x1x32xf32> to vector<1x32xf32>
      %194 = vector.shape_cast %191 : vector<1x32xf32> to vector<1x1x32xf32>
      tpu.vector_store %arg20[%c0_75, %c0_76, %c0_77], %194 {strides = array<i32>} : memref<1x1x32xf32, #tpu.memory_space<vmem>>, vector<1x1x32xf32>,
    } else {
    }
    return
  }
  func.func @transform_0(%arg0: i32, %arg1: i32, %arg2: memref<2xi32, #tpu.memory_space<smem>>) -> (i32, i32, i32) {
    %c0_i32 = arith.constant 0 : i32
    %c0_i32_0 = arith.constant 0 : i32
    %c0_i32_1 = arith.constant 0 : i32
    return %arg0, %c0_i32, %c0_i32_0 : i32, i32, i32
  }
  func.func @transform_1(%arg0: i32, %arg1: i32, %arg2: memref<2xi32, #tpu.memory_space<smem>>) -> (i32, i32) {
    %c0_i32 = arith.constant 0 : i32
    %c0_i32_0 = arith.constant 0 : i32
    %c0_i32_1 = arith.constant 0 : i32
    return %c0_i32, %c0_i32_0 : i32, i32
  }
  func.func @transform_2(%arg0: i32, %arg1: i32, %arg2: memref<2xi32, #tpu.memory_space<smem>>) -> (i32, i32, i32) {
    %c0_i32 = arith.constant 0 : i32
    %c0_i32_0 = arith.constant 0 : i32
    %c0_i32_1 = arith.constant 0 : i32
    return %arg1, %c0_i32, %c0_i32_0 : i32, i32, i32
  }
  func.func @transform_3(%arg0: i32, %arg1: i32, %arg2: memref<2xi32, #tpu.memory_space<smem>>) -> (i32, i32, i32) {
    %c0_i32 = arith.constant 0 : i32
    %c0_i32_0 = arith.constant 0 : i32
    %c0_i32_1 = arith.constant 0 : i32
    return %arg1, %c0_i32, %c0_i32_0 : i32, i32, i32
  }
  func.func @transform_4(%arg0: i32, %arg1: i32, %arg2: memref<2xi32, #tpu.memory_space<smem>>) -> (i32, i32, i32) {
    %c0_i32 = arith.constant 0 : i32
    %c0_i32_0 = arith.constant 0 : i32
    %c0_i32_1 = arith.constant 0 : i32
    return %arg1, %c0_i32, %c0_i32_0 : i32, i32, i32
  }
  func.func @transform_5(%arg0: i32, %arg1: i32, %arg2: memref<2xi32, #tpu.memory_space<smem>>) -> (i32, i32, i32) {
    %c0_i32 = arith.constant 0 : i32
    %c0_i32_0 = arith.constant 0 : i32
    %c0_i32_1 = arith.constant 0 : i32
    return %arg1, %c0_i32, %c0_i32_0 : i32, i32, i32
  }
  func.func @transform_6(%arg0: i32, %arg1: i32, %arg2: memref<2xi32, #tpu.memory_space<smem>>) -> (i32, i32, i32) {
    %c0_i32 = arith.constant 0 : i32
    %c0_i32_0 = arith.constant 0 : i32
    %c0_i32_1 = arith.constant 0 : i32
    return %arg1, %c0_i32, %c0_i32_0 : i32, i32, i32
  }
  func.func @transform_7(%arg0: i32, %arg1: i32, %arg2: memref<2xi32, #tpu.memory_space<smem>>) -> (i32, i32, i32) {
    %c0_i32 = arith.constant 0 : i32
    %c0_i32_0 = arith.constant 0 : i32
    %c0_i32_1 = arith.constant 0 : i32
    return %arg1, %c0_i32, %c0_i32_0 : i32, i32, i32
  }
  func.func @transform_8(%arg0: i32, %arg1: i32, %arg2: memref<2xi32, #tpu.memory_space<smem>>) -> (i32, i32, i32) {
    %c0_i32 = arith.constant 0 : i32
    %c0_i32_0 = arith.constant 0 : i32
    %c0_i32_1 = arith.constant 0 : i32
    return %arg1, %c0_i32, %c0_i32_0 : i32, i32, i32
  }
  func.func @transform_9(%arg0: i32, %arg1: i32, %arg2: memref<2xi32, #tpu.memory_space<smem>>) -> (i32, i32, i32) {
    %c0_i32 = arith.constant 0 : i32
    %c0_i32_0 = arith.constant 0 : i32
    %c0_i32_1 = arith.constant 0 : i32
    return %arg1, %c0_i32, %c0_i32_0 : i32, i32, i32
  }
  func.func @transform_10(%arg0: i32, %arg1: i32, %arg2: memref<2xi32, #tpu.memory_space<smem>>) -> (i32, i32, i32) {
    %c0_i32 = arith.constant 0 : i32
    %c0_i32_0 = arith.constant 0 : i32
    %c0_i32_1 = arith.constant 0 : i32
    return %arg1, %c0_i32, %c0_i32_0 : i32, i32, i32
  }
  func.func @transform_11(%arg0: i32, %arg1: i32, %arg2: memref<2xi32, #tpu.memory_space<smem>>) -> (i32, i32, i32) {
    %c0_i32 = arith.constant 0 : i32
    %c0_i32_0 = arith.constant 0 : i32
    %c0_i32_1 = arith.constant 0 : i32
    return %arg1, %c0_i32, %c0_i32_0 : i32, i32, i32
  }
  func.func @transform_12(%arg0: i32, %arg1: i32, %arg2: memref<2xi32, #tpu.memory_space<smem>>) -> (i32, i32, i32) {
    %c0_i32 = arith.constant 0 : i32
    %c0_i32_0 = arith.constant 0 : i32
    %c0_i32_1 = arith.constant 0 : i32
    return %arg1, %c0_i32, %c0_i32_0 : i32, i32, i32
  }
  func.func @transform_13(%arg0: i32, %arg1: i32, %arg2: memref<2xi32, #tpu.memory_space<smem>>) -> (i32, i32, i32) {
    %c0_i32 = arith.constant 0 : i32
    %c0_i32_0 = arith.constant 0 : i32
    %c0_i32_1 = arith.constant 0 : i32
    return %arg1, %c0_i32, %c0_i32_0 : i32, i32, i32
  }
  func.func @transform_14(%arg0: i32, %arg1: i32, %arg2: memref<2xi32, #tpu.memory_space<smem>>) -> (i32, i32) {
    %c0_i32 = arith.constant 0 : i32
    %c0_i32_0 = arith.constant 0 : i32
    %c0_i32_1 = arith.constant 0 : i32
    return %c0_i32, %c0_i32_0 : i32, i32
  }
  func.func @transform_15(%arg0: i32, %arg1: i32, %arg2: memref<2xi32, #tpu.memory_space<smem>>) -> (i32, i32) {
    %c0_i32 = arith.constant 0 : i32
    %c0_i32_0 = arith.constant 0 : i32
    %c0_i32_1 = arith.constant 0 : i32
    return %c0_i32, %c0_i32_0 : i32, i32
  }
  func.func @transform_16(%arg0: i32, %arg1: i32, %arg2: memref<2xi32, #tpu.memory_space<smem>>) -> (i32, i32) {
    %c0_i32 = arith.constant 0 : i32
    %c0_i32_0 = arith.constant 0 : i32
    %c0_i32_1 = arith.constant 0 : i32
    return %c0_i32, %c0_i32_0 : i32, i32
  }
  func.func @transform_17(%arg0: i32, %arg1: i32, %arg2: memref<2xi32, #tpu.memory_space<smem>>) -> (i32, i32, i32) {
    %c0_i32 = arith.constant 0 : i32
    %c0_i32_0 = arith.constant 0 : i32
    %c0_i32_1 = arith.constant 0 : i32
    return %arg0, %c0_i32, %c0_i32_0 : i32, i32, i32
  }
}

</mosaic_0001>

<bundles_post_ra>
// kernel: text_encoder_forward.1
= control target key start
LH: loop header
LB: loop body
LE: loop exit
PB: predicated region body
PF: predicated region fallthrough
CT: control target
= control target key end

     0   :  { %s1993_s30 = smov [#allocation4]   ;;  %s2426_s0 = inlined_call_operand.vmem [shape: s32[2], index: 0, kind: input, shape index: {}]   ;;  %s2427_s1 = inlined_call_operand.vmem [shape: f32[2,8,32], index: 1, kind: input, shape index: {}]   ;;  %s2428_s2 = inlined_call_operand.vmem [shape: f32[8,32], index: 2, kind: input, shape index: {}]   ;;  %s2429_s3 = inlined_call_operand.vmem [shape: f32[2,1,32], index: 3, kind: input, shape index: {}]   ;;  %s2430_s4 = inlined_call_operand.vmem [shape: f32[2,1,32], index: 4, kind: input, shape index: {}]   ;;  %s2431_s5 = inlined_call_operand.vmem [shape: bf16[2,32,96], index: 5, kind: input, shape index: {}]   ;;  %s2432_s6 = inlined_call_operand.vmem [shape: f32[2,1,96], index: 6, kind: input, shape index: {}]   ;;  %s2433_s7 = inlined_call_operand.vmem [shape: bf16[2,32,32], index: 7, kind: input, shape index: {}]   ;;  %s2434_s8 = inlined_call_operand.vmem [shape: f32[2,1,32], index: 8, kind: input, shape index: {}]   ;;  %s2435_s9 = inlined_call_operand.vmem [shape: f32[2,1,32], index: 9, kind: input, shape index: {}]   ;;  %s2436_s10 = inlined_call_operand.vmem [shape: f32[2,1,32], index: 10, kind: input, shape index: {}]   ;;  %s2437_s11 = inlined_call_operand.vmem [shape: bf16[2,32,128], index: 11, kind: input, shape index: {}]   ;;  %s2438_s12 = inlined_call_operand.vmem [shape: f32[2,1,128], index: 12, kind: input, shape index: {}]   ;;  %s2439_s13 = inlined_call_operand.vmem [shape: bf16[2,128,32], index: 13, kind: input, shape index: {}]   ;;  %s2440_s14 = inlined_call_operand.vmem [shape: f32[2,1,32], index: 14, kind: input, shape index: {}]   ;;  %s2441_s15 = inlined_call_operand.vmem [shape: f32[1,32], index: 15, kind: input, shape index: {}]   ;;  %s2442_s16 = inlined_call_operand.vmem [shape: f32[1,32], index: 16, kind: input, shape index: {}]   ;;  %s2443_s17 = inlined_call_operand.vmem [shape: bf16[32,32], index: 17, kind: input, shape index: {}]   ;;  %s2444_s18 = inlined_call_operand.hbm [shape: f32[2,1,32], index: 18, kind: output, shape index: {}]  }
   0x1   :  { %2459 = sst [smem:[#allocation21_spill]] %s2426_s0 }
   0x2   :  { %2460 = sst [smem:[#allocation22_spill]] %s2427_s1 }
   0x3   :  { %2461 = sst [smem:[#allocation23_spill]] %s2428_s2 }
   0x4   :  { %2462 = sst [smem:[#allocation24_spill]] %s2430_s4 }
   0x5   :  { %2463 = sst [smem:[#allocation25_spill]] %s2431_s5 }
   0x6   :  { %2464 = sst [smem:[#allocation26_spill]] %s2433_s7 }
   0x7   :  { %2465 = sst [smem:[#allocation27_spill]] %s2438_s12 }
   0x8   :  { %2466 = sst [smem:[#allocation28_spill]] %s2441_s15 }
   0x9   :  { %2467 = sst [smem:[#allocation29_spill]] %s2442_s16 }
   0xa   :  { %2468 = sst [smem:[#allocation30_spill]] %s2443_s17 }
   0xb   :  { %2469 = sst [smem:[#allocation31_spill]] %s2444_s18 }
   0xc   :  { %s2470_s29 = sld [smem:[#allocation21_spill]] }
  0x12   :  { %s24_s12 = sshll.u32 %s2470_s29, 4  ;;  %s25_s12 = int_to_ptr.vmem [resolvable:$true] %s24_s12 }
  0x13   :  { %27 = dma.vmem_to_smem %s25_s12, 16, %s1993_s30, [#allocation3] }
  0x14   :  { %1955 = dma.done.wait [#allocation3], 16 }
  0x15   :  { %1956 = vsyncadd [#allocation3], 4294967280 }
  0x16   :  { %30 = sfence }
  0x17   :  { %31 = vsyncpa [#allocation6], 0 }
  0x18   :  { %33 = vsyncpa [#allocation6 + $0x1], 0  ;;  %s2103_s0 = smov 0   ;;  %s2105_s19 = smov 0  }
  0x19   :  { %s2107_s1 = smov 0   ;;  %s2109_s20 = smov 0  }
  0x1a   :  { %s2111_s21 = smov 0   ;;  %s2113_s22 = smov 0  }
  0x1b   :  { %s2115_s2 = smov 0   ;;  %s2117_s12 = smov 0  }
  0x1c LB: > { %2471 = sst [smem:[#allocation9_spill]] %s1963_s0  ;;  %s1633_s23 = sadd.s32 4294967295, %s1991_s12   ;;  %s1991_s12 = sphi %s2117_s12, %s39_s12   ;;  %s1987_s2 = sphi %s2115_s2, %s2517_s2   ;;  %s1983_s22 = sphi %s2113_s22, %s2516_s22   ;;  %s1979_s21 = sphi %s2111_s21, %s2515_s21   ;;  %s1975_s20 = sphi %s2109_s20, %s2514_s20   ;;  %s1971_s1 = sphi %s2107_s1, %s2513_s1   ;;  %s1967_s19 = sphi %s2105_s19, %s2519_s19   ;;  %s1963_s0 = sphi %s2103_s0, %s2518_s0  }
  0x1d   : > { %2472 = sst [smem:[#allocation10_spill]] %s1971_s1  ;;  %s1634_s24 = sadd.s32 4294967294, %s1991_s12  }
  0x1e   : > { %2473 = sst [smem:[#allocation11_spill]] %s1979_s21  ;;  %s48_s25 = sadd.s32 1, %s1983_s22 }
  0x1f   : > { %2474 = sst [smem:[#allocation12_spill]] %s1983_s22  ;;  %p49_p0 = scmp.ge.s32.totalorder %s48_s25, 2 }
  0x20   : > { %2475 = sst [smem:[#allocation13_spill]] %s1987_s2  ;;  %s51_s26 = sadd.s32 1, %s1987_s2 }
  0x21   : > { %2476 = sst [smem:[#allocation14_spill]] %s1991_s12  ;;  %p490_p1 = scmp.ne.s32.totalorder %s1971_s1, %s1967_s19 }
  0x22   : > { %p491_p2 = scmp.eq.s32.totalorder %s1633_s23, 3  ;;  %s2521_s25 = smov (%p49_p0, %s48_s25), 0 }
  0x23   : > { %2477 = sst [smem:[#allocation15_spill]] %s2521_s25  ;;  %s2523_s26 = smov (!%p49_p0, %s51_s26), %s1987_s2 }
  0x24   : > { %p2152_p3 = por %p491_p2, %p490_p1  ;;  %p496_p4 = scmp.ne.s32.totalorder %s1967_s19, %s1963_s0 }
  0x25   : > { %p53_p5 = scmp.ge.s32.totalorder %s2523_s26, 2  ;;  %p497_p6 = scmp.eq.s32.totalorder %s1634_s24, 3 }
  0x26   : > { %s2478_s27 = scalar_select %p2152_p3, 1, 0 }
  0x27   : > { %p1637_p7 = scmp.ge.s32.totalorder %s1991_s12, 1  ;;  %p614_p8 = scmp.lt.s32.totalorder %s1991_s12, 5 }
  0x28   : > { %2479 = sst [smem:[#allocation16_spill]] %s2478_s27  ;;  %s2525_s26 = smov (%p53_p5, %s2523_s26), 0 }
  0x29   : > { %2480 = sst [smem:[#allocation17_spill]] %s2525_s26  ;;  %p2162_p9 = por %p497_p6, %p496_p4 }
  0x2a   : > { %p615_p10 = pnand %p1637_p7, %p614_p8  ;;  %s477_s29 = ssub.s32 %s1987_s2, %s2525_s26 }
  0x2b   : > { %s2481_s28 = scalar_select %p2162_p9, 1, 0 }
  0x2c   : > { %s480_s30 = sadd.s32 1, %s1971_s1  ;;  %p478_p11 = scmp.eq.s32.totalorder %s477_s29, 0 }
  0x2d   : > { %2482 = sst [smem:[#allocation18_spill]] %s2481_s28  ;;  %618 = sbr.rel (%p615_p10) target bundleno = 2632 (0xa48), region = 88 }
  0x2e   : > { %s2170_s23 = scalar_select %p478_p11, %s1971_s1, %s480_s30  }
  0x30   : > { %2483 = sst [smem:[#allocation19_spill]] %s2170_s23 }
  0x32   : > { %p708_p12 = scmp.lt.s32.totalorder %s1979_s21, 1  ;;  %p712_p13 = scmp.lt.s32.totalorder %s1975_s20, 1 }
  0x33   : > { %s2484_s2 = sld [smem:[#allocation22_spill]]  ;;  %s2490_s15 = sand.u32 1, %s1967_s19  }
  0x34   : > { %s709_s25 = scalar_select %p708_p12, %s1979_s21, 1 }
  0x35   : > { %s2177_s22 = scalar_select %p712_p13, %s1975_s20, 1 }
  0x36   : > { %s1638_s29 = sshll.u32 %s709_s25, 3  ;;  %s2486_s5 = sld [smem:[#allocation25_spill]] }
  0x37   : > { %s1734_s18 = sshll.u32 %s2177_s22, 4  ;;  %s2487_s7 = sld [smem:[#allocation26_spill]] }
  0x38   : > { %s2220_s25 = scalar_lea.vmem %s2437_s11, %s1734_s18  ;;  %s2489_s26 = sld [smem:[#allocation27_spill]] }
  0x39   : > { %s711_s24 = scalar_lea.vmem %s2484_s2, %s1638_s29  ;;  %s755_s0 = scalar_lea.vmem %s2440_s14, %s2177_s22 }
  0x3a   : > { %s2238_s16 = scalar_lea.vmem [#allocation5], %s2490_s15  ;;  %p1647_p0 = scmp.ne.s32.totalorder %s1975_s20, 0 }
  0x3c   : > { %s2194_s17 = scalar_lea.vmem %s2486_s5, %s1734_s18  ;;  %s739_s5 = scalar_lea.vmem %s2436_s10, %s2177_s22 }
  0x3d   : > { %s2203_s29 = scalar_lea.vmem %s2487_s7, %s1734_s18  ;;  %760 = sbr.rel (%p1647_p0) target bundleno = 73 (0x49), region = 92 }
  0x3e   : > { %2488 = sst [smem:[#allocation20_spill]] %s2203_s29  ;;  %s747_s7 = scalar_lea.vmem %s2489_s26, %s2177_s22 }
  0x3f   : > { %s1737_s29 = sshll.u32 %s2177_s22, 6  ;;  %s2491_s26 = sld [smem:[#allocation23_spill]] (!%p1647_p0) }
  0x40   : > { %s2234_s28 = scalar_lea.vmem %s2439_s13, %s1737_s29 }
  0x42   : > { %v761_v0 = vld [vmem:[%s711_s24] sm:$0xff]  ;;  %vm764_vm0 = vcmask 261120  }
  0x45   : > { %v762_v1 = vld [vmem:[%s2491_s26] sm:$0xff] }
  0x46   : > { %v763_v2 = vadd.f32 %v762_v1, %v761_v0 }
  0x48   : > { %765 = vst.msk [vmem:[#allocation2] sm:$0xff] %vm764_vm0, %v763_v2 }
  0x49 PF: > { %vm775_vm1 = vcmask 261120   ;;  %v1994_v5 = vmov 32.0   ;;  %v1739_v17 = vld [vmem:[%s2194_s17 + $0x8] sm:$0xff]  ;;  %v1738_v18 = vld [vmem:[%s2194_s17] sm:$0xff]  ;;  %s2492_s17 = scalar_lea.vmem %s2429_s3, %s2177_s22  ;;  %s2493_s2 = sld [smem:[#allocation24_spill]]  ;;  %vm859_vm6 = vcmask 64512   ;;  %v767_v43 = vlaneseq }
  0x4a   : > { %1855 = vrcp.f32 %v1994_v5  ;;  %843 = vmatpush.bf16.msra.mxu0 %v1739_v17  ;;  %v1847_v28 = vld [vmem:[%s2492_s17] ss:$0 sm:$0xff]  ;;  %s2495_s12 = scalar_lea.vmem %s2432_s6, %s2177_s22  ;;  %s1995_s15 = smov 104   ;;  %v1999_v48 = vmov -1e+09   ;;  %vm1123_vm8 = vcmask 130048  }
  0x4b   : > { %v1849_v35 = vld [vmem:[%s2495_s12] ss:$0 sm:$0xff]  ;;  %s1996_s4 = smov 120   ;;  %s1997_s18 = smov 96   ;;  %v768_v44 = vshrl.u32 %v767_v43, 7  ;;  %v2280_v45 = vand.u32 127, %v767_v43 }
  0x4c   : > { %s1998_s26 = smov 112   ;;  %s2000_s24 = smov 64   ;;  %vm1125_vm9 = vcmask 195584  }
  0x4d   : > { %vm771_vm7 = vcmp.le.s32.totalorder %v2280_v45, %v768_v44  ;;  %s2496_s29 = sld [smem:[#allocation20_spill]]  ;;  %s2001_s17 = smov 8  }
  0x4e   : > { %844 = vmatpush.bf16.msra.mxu0 %v1738_v18  ;;  %v772_v49 = vsel %vm771_vm7, 0.0, %v1999_v48  ;;  %s2002_s21 = smov 24   ;;  %s2003_s30 = smov 16  }
  0x4f   : > { %v2244_v3 = vld [vmem:[#allocation2] sm:$0xff]  ;;  %s2494_s1 = scalar_lea.vmem %s2493_s2, %s2177_s22  ;;  %s2497_s23 = scalar_lea.vmem %s2434_s8, %s2177_s22 }
  0x50   : > { %v776_v4 = vsel %vm775_vm1, %v2244_v3, 0.0  ;;  %v1856_v6 = vpop.eup %1855  ;;  %v1848_v31 = vld [vmem:[%s2494_s1] ss:$0 sm:$0xff]  ;;  %s2498_s12 = scalar_lea.vmem %s2435_s9, %s2177_s22  ;;  %p1720_p1 = scmp.ne.s32.totalorder %s1975_s20, 1 }
  0x51   : > { %777 = vadd.xlane.f32.xlu0 %v776_v4  ;;  %v780_v7 = vmul.f32 32.0, %v1856_v6  ;;  %vm784_vm2 = vweird.f32 %v1856_v6 }
  0x53   : > { %v781_v8 = vsub.f32 1.0, %v780_v7 }
  0x55   : > { %v782_v9 = vmul.f32 %v1856_v6, %v781_v8 }
  0x57   : > { %v783_v10 = vadd.f32 %v1856_v6, %v782_v9 }
  0x59   : > { %v2248_v11 = vsel %vm784_vm2, %v1856_v6, %v783_v10 }
  0xc4   : > { %v778_v12 = vpop.xlane.xlu0 %777 }
  0xc5   : > { %v786_v13 = vmul.f32 %v2248_v11, %v778_v12 }
  0xc7   : > { %v787_v14 = vsub.f32 %v2244_v3, %v786_v13 }
  0xc9   : > { %v788_v15 = vmul.f32 %v787_v14, %v787_v14 }
  0xcb   : > { %v789_v16 = vsel %vm775_vm1, %v788_v15, 0.0 }
  0xcc   : > { %790 = vadd.xlane.f32.xlu0 %v789_v16 }
 0x13f   : > { %v791_v19 = vpop.xlane.xlu0 %790 }
 0x140   : > { %v792_v20 = vmul.f32 %v791_v19, %v2248_v11 }
 0x142   : > { %v793_v21 = vadd.f32 1e-05, %v792_v20 }
 0x144   : > { %1857 = vrsqrt.f32 %v793_v21  ;;  %vm800_vm4 = vweird.f32 %v793_v21 }
 0x14a   : > { %v1858_v22 = vpop.eup %1857 }
 0x14b   : > { %v795_v23 = vmul.f32 %v1858_v22, %v793_v21  ;;  %vm801_vm3 = vweird.f32 %v1858_v22 }
 0x14c   : > { %vm802_vm5 = vmor %vm800_vm4, %vm801_vm3 }
 0x14d   : > { %v796_v24 = vmul.f32 %v1858_v22, %v795_v23 }
 0x14f   : > { %v797_v25 = vmul.f32 0.5, %v796_v24 }
 0x151   : > { %v798_v26 = vsub.f32 1.5, %v797_v25 }
 0x153   : > { %v799_v27 = vmul.f32 %v1858_v22, %v798_v26 }
 0x155   : > { %v803_v29 = vsel %vm802_vm5, %v1858_v22, %v799_v27 }
 0x156   : > { %v804_v30 = vmul.f32 %v803_v29, %v787_v14 }
 0x158   : > { %v808_v32 = vmul.f32 %v1847_v28, %v804_v30 }
 0x15a   : > { %v812_v33 = vadd.f32 %v1848_v31, %v808_v32 }
 0x15c   : > { %v813_v34 = vpack.c.bf16 %v812_v33, %v812_v33 }
 0x15e   : > { %1656 = vmatmul.msk.bf16.vlgmr.msra.gmra.mxu0 %vm775_vm1, %v813_v34 }
 0x1db   : > { %v846_v36 = vpop.f32.mrf.mxu0 }
 0x1dc   : > { %v847_v37 = vadd.f32 %v1849_v35, %v846_v36 }
 0x1de   : > { %855 = vrot.lane.b32.xlu2 %v847_v37, %s1995_s15  ;;  %851 = vrot.lane.b32.xlu1 %v847_v37, %s1996_s4 }
 0x1e3   : > { %v848_v38 = vpop.f32.mrf.mxu0 }
 0x1e6   : > { %857 = vrot.lane.b32.xlu2 %v847_v37, %s1997_s18  ;;  %853 = vrot.lane.b32.xlu1 %v847_v37, %s1998_s26 }
 0x238   : > { %v2272_v39 = vpop.permute.xlu2 %855 }
 0x239   : > { %936 = vrot.lane.b32.xlu2 %v2272_v39, %s1997_s18 }
 0x240   : > { %v858_v40 = vpop.permute.xlu2 %857 }
 0x241   : > { %1657 = vmatpush.xpose.msk.msra.mxu2 %vm859_vm6, %v858_v40 }
 0x244   : > { %1658 = vmatmul.msk.f32.vlgmr.msra.gmra.mxu2 %vm859_vm6, %v847_v37 }
 0x250   : > { %v852_v41 = vpop.permute.xlu1 %851 }
 0x251   : > { %884 = vrot.lane.b32.xlu0 %v852_v41, %s1997_s18  ;;  %v1837_v5 = vpack.i.bf16 %v847_v37, %v852_v41 }
 0x258   : > { %v2277_v42 = vpop.permute.xlu1 %853 }
 0x259   : > { %910 = vrot.lane.b32.xlu1 %v2277_v42, %s1997_s18  ;;  %v1842_v28 = vpack.i.bf16 %v2272_v39, %v2277_v42 }
 0x293   : > { %v937_v47 = vpop.permute.xlu2 %936 }
 0x2c3   : > { %v885_v46 = vpop.permute.xlu0 %884 }
 0x2c4   : > { %1659 = vmatpush.xpose.msk.msrb.mxu2 %vm859_vm6, %v885_v46  ;;  %v1741_v46 = vld [vmem:[%s2496_s29 + $0x8] sm:$0xff] }
 0x2c7   : > { %v881_v50 = vpop.f32.mrf.mxu2  ;;  %1660 = vmatmul.msk.f32.vlgmr.msrb.gmra.mxu2 %vm859_vm6, %v852_v41 }
 0x2c8   : > { %1663 = vmatpush.xpose.msk.msra.mxu2 %vm859_vm6, %v937_v47  ;;  %v882_v51 = vadd.f32 %v881_v50, %v772_v49  ;;  %v1740_v47 = vld [vmem:[%s2496_s29] sm:$0xff] }
 0x2ca   : > { %v962_v52 = vsel %vm859_vm6, %v882_v51, -inf }
 0x2cb   : > { %963 = vmax.xlane.f32.xlu2 %v962_v52  ;;  %v911_v53 = vpop.permute.xlu1 %910 }
 0x2cc   : > { %1661 = vmatpush.xpose.msk.msra.mxu3 %vm859_vm6, %v911_v53 }
 0x2cf   : > { %1662 = vmatmul.msk.f32.vlgmr.msra.gmra.mxu3 %vm859_vm6, %v2277_v42  ;;  %1664 = vmatmul.msk.f32.vlgmr.msra.gmra.mxu2 %vm859_vm6, %v2272_v39 }
 0x33e   : > { %v964_v54 = vpop.xlane.xlu2 %963 }
 0x33f   : > { %v974_v57 = vsub.f32 %v882_v51, %v964_v54 }
 0x341   : > { %v978_v59 = vmul.f32 1.442695, %v974_v57 }
 0x343   : > { %1859 = vpow2.f32 %v978_v59 }
 0x349   : > { %v1860_v2 = vpop.eup %1859 }
 0x34a   : > { %v907_v55 = vpop.f32.mrf.mxu2  ;;  %v986_v4 = vsel %vm859_vm6, %v1860_v2, 0.0 }
 0x34b   : > { %v908_v56 = vadd.f32 %v907_v55, %v772_v49  ;;  %v1850_v55 = vld [vmem:[%s2497_s23] ss:$0 sm:$0xff]  ;;  %s2503_s23 = sld [smem:[#allocation28_spill]] (!%p1720_p1) }
 0x34d   : > { %v965_v58 = vsel %vm859_vm6, %v908_v56, -inf }
 0x34e   : > { %966 = vmax.xlane.f32.xlu1 %v965_v58 }
 0x352   : > { %v933_v60 = vpop.f32.mrf.mxu3  ;;  %v959_v61 = vpop.f32.mrf.mxu2 }
 0x353   : > { %v934_v62 = vadd.f32 %v933_v60, %v772_v49  ;;  %v960_v63 = vadd.f32 %v959_v61, %v772_v49 }
 0x355   : > { %v971_v0 = vsel %vm859_vm6, %v960_v63, -inf  ;;  %v968_v1 = vsel %vm859_vm6, %v934_v62, -inf }
 0x356   : > { %972 = vmax.xlane.f32.xlu2 %v971_v0  ;;  %969 = vmax.xlane.f32.xlu0 %v968_v1 }
 0x35e   : > { %987 = vadd.xlane.f32.xlu2 %v986_v4 }
 0x376   : > { %1838 = vrot.lane.b32.xlu2 %v1837_v5, %s2000_s24 }
 0x3c1   : > { %v967_v6 = vpop.xlane.xlu1 %966 }
 0x3c2   : > { %v975_v7 = vsub.f32 %v908_v56, %v967_v6 }
 0x3c4   : > { %v980_v8 = vmul.f32 1.442695, %v975_v7 }
 0x3c6   : > { %1861 = vpow2.f32 %v980_v8 }
 0x3c9   : > { %v973_v9 = vpop.xlane.xlu2 %972  ;;  %v970_v10 = vpop.xlane.xlu0 %969 }
 0x3ca   : > { %v977_v12 = vsub.f32 %v960_v63, %v973_v9  ;;  %v976_v13 = vsub.f32 %v934_v62, %v970_v10 }
 0x3cc   : > { %v1862_v14 = vpop.eup %1861  ;;  %v984_v15 = vmul.f32 1.442695, %v977_v12  ;;  %v982_v16 = vmul.f32 1.442695, %v976_v13 }
 0x3cd   : > { %v989_v17 = vsel %vm859_vm6, %v1862_v14, 0.0 }
 0x3ce   : > { %1863 = vpow2.f32 %v984_v15  ;;  %990 = vadd.xlane.f32.xlu1 %v989_v17  ;;  %v1852_v17 = vld [vmem:[%s739_s5] ss:$0 sm:$0xff] }
 0x3cf   : > { %1865 = vpow2.f32 %v982_v16 }
 0x3d1   : > { %v988_v18 = vpop.xlane.xlu2 %987 }
 0x3d2   : > { %1867 = vrcp.f32 %v988_v18 }
 0x3d4   : > { %v1864_v19 = vpop.eup %1863 }
 0x3d5   : > { %v1866_v20 = vpop.eup %1865  ;;  %v995_v21 = vsel %vm859_vm6, %v1864_v19, 0.0 }
 0x3d6   : > { %996 = vadd.xlane.f32.xlu0 %v995_v21  ;;  %v992_v22 = vsel %vm859_vm6, %v1866_v20, 0.0  ;;  %v1751_v21 = vld [vmem:[%s2234_s28 + $0x38] sm:$0xff] }
 0x3d7   : > { %993 = vadd.xlane.f32.xlu1 %v992_v22  ;;  %1321 = vmatpush.bf16.msra.mxu1 %v1751_v21  ;;  %v1750_v22 = vld [vmem:[%s2234_s28 + $0x30] sm:$0xff] }
 0x3d8   : > { %v1868_v23 = vpop.eup %1867 }
 0x3d9   : > { %v1839_v24 = vpop.permute.xlu2 %1838  ;;  %v1002_v27 = vmul.f32 %v1868_v23, %v1860_v2  ;;  %v1743_v2 = vld [vmem:[%s2220_s25 + $0x8] sm:$0xff] }
 0x3da   : > { %v1841_v25 = vunpack.i.h.bf16 %v1839_v24  ;;  %v1840_v26 = vunpack.i.l.bf16 %v1839_v24  ;;  %1228 = vmatpush.bf16.msrb.mxu0 %v1743_v2  ;;  %v1749_v23 = vld [vmem:[%s2234_s28 + $0x28] sm:$0xff]  ;;  %v1748_v24 = vld [vmem:[%s2234_s28 + $0x20] sm:$0xff] }
 0x3db   : > { %1322 = vmatpush.bf16.msra.mxu1 %v1750_v22 }
 0x3dc   : > { %1027 = vmatpush.msrb.mxu2 %v1841_v25  ;;  %1053 = vmatpush.msrb.mxu3 %v1840_v26  ;;  %v1747_v25 = vld [vmem:[%s2234_s28 + $0x18] sm:$0xff]  ;;  %v1746_v26 = vld [vmem:[%s2234_s28 + $0x10] sm:$0xff] }
 0x3dd   : > { %1665 = vmatmul.msk.f32.vlgmr.msrb.gmra.mxu2 %vm859_vm6, %v1002_v27  ;;  %v1745_v27 = vld [vmem:[%s2234_s28 + $0x8] sm:$0xff] }
 0x3df   : > { %1323 = vmatpush.bf16.msra.mxu1 %v1749_v23 }
 0x3e3   : > { %1324 = vmatpush.bf16.msra.mxu1 %v1748_v24 }
 0x3e7   : > { %1325 = vmatpush.bf16.msra.mxu1 %v1747_v25 }
 0x3eb   : > { %1326 = vmatpush.bf16.msra.mxu1 %v1746_v26 }
 0x3ef   : > { %1327 = vmatpush.bf16.msra.mxu1 %v1745_v27 }
 0x3f0   : > { %1843 = vrot.lane.b32.xlu1 %v1842_v28, %s2000_s24  ;;  %v1853_v28 = vld [vmem:[%s747_s7] ss:$0 sm:$0xff]  ;;  %s2500_s24 = sld [smem:[#allocation11_spill]] (!%p1720_p1) }
 0x3f6   : > { %s1345_s29 = sld [smem:[#allocation4 + %s2500_s24]] (!%p1720_p1) }
 0x441   : > { %v991_v29 = vpop.xlane.xlu1 %990 }
 0x442   : > { %1869 = vrcp.f32 %v991_v29  ;;  %v1744_v29 = vld [vmem:[%s2234_s28] sm:$0xff] }
 0x443   : > { %1328 = vmatpush.bf16.msra.mxu1 %v1744_v29 }
 0x448   : > { %v1870_v30 = vpop.eup %1869 }
 0x449   : > { %v1003_v31 = vmul.f32 %v1870_v30, %v1862_v14  ;;  %v997_v32 = vpop.xlane.xlu0 %996  ;;  %v1851_v14 = vld [vmem:[%s2498_s12] ss:$0 sm:$0xff]  ;;  %s2504_s12 = sld [smem:[#allocation29_spill]] (!%p1720_p1) }
 0x44a   : > { %v994_v33 = vpop.xlane.xlu1 %993  ;;  %1871 = vrcp.f32 %v997_v32 }
 0x44b   : > { %1666 = vmatmul.msk.f32.vlgmr.msrb.gmra.mxu3 %vm859_vm6, %v1003_v31  ;;  %1873 = vrcp.f32 %v994_v33 }
 0x450   : > { %v1872_v34 = vpop.eup %1871 }
 0x451   : > { %v1874_v35 = vpop.eup %1873  ;;  %v1005_v40 = vmul.f32 %v1872_v34, %v1864_v19 }
 0x452   : > { %v1004_v39 = vmul.f32 %v1874_v35, %v1866_v20 }
 0x460   : > { %v1029_v42 = vpop.f32.mrf.mxu2 }
 0x462   : > { %v1844_v36 = vpop.permute.xlu1 %1843 }
 0x463   : > { %v1846_v37 = vunpack.i.h.bf16 %v1844_v36  ;;  %v1845_v38 = vunpack.i.l.bf16 %v1844_v36 }
 0x465   : > { %1079 = vmatpush.msra.mxu3 %v1845_v38  ;;  %1105 = vmatpush.msra.mxu2 %v1846_v37 }
 0x466   : > { %1667 = vmatmul.msk.f32.vlgmr.msra.gmra.mxu3 %vm859_vm6, %v1004_v39  ;;  %1668 = vmatmul.msk.f32.vlgmr.msra.gmra.mxu2 %vm859_vm6, %v1005_v40 }
 0x467   : > { %1153 = vmatpush.bf16.msrb.mxu3 %v1741_v46 }
 0x46b   : > { %1154 = vmatpush.bf16.msrb.mxu3 %v1740_v47 }
 0x4ce   : > { %v1055_v41 = vpop.f32.mrf.mxu3 }
 0x4cf   : > { %1111 = vrot.lane.b32.xlu0 %v1055_v41, %s2001_s17 }
 0x4e9   : > { %v1081_v43 = vpop.f32.mrf.mxu3  ;;  %v1107_v44 = vpop.f32.mrf.mxu2 }
 0x4ea   : > { %1119 = vrot.lane.b32.xlu0 %v1107_v44, %s2002_s21  ;;  %1115 = vrot.lane.b32.xlu2 %v1081_v43, %s2003_s30 }
 0x541   : > { %v1112_v48 = vpop.permute.xlu0 %1111 }
 0x542   : > { %v1122_v49 = vsel %vm859_vm6, %v1029_v42, %v1112_v48 }
 0x544   : > { %v1116_v50 = vpop.permute.xlu2 %1115 }
 0x545   : > { %v1124_v51 = vsel %vm1123_vm8, %v1122_v49, %v1116_v50  ;;  %v1854_v50 = vld [vmem:[%s755_s0] ss:$0 sm:$0xff]  ;;  %s2501_s0 = sld [smem:[#allocation30_spill]] (!%p1720_p1) }
 0x54b   : > { %s2502_s17 = smov (!%p1720_p1), %s2501_s0 }
 0x55c   : > { %v1120_v52 = vpop.permute.xlu0 %1119 }
 0x55d   : > { %v1126_v53 = vsel %vm1125_vm9, %v1124_v51, %v1120_v52 }
 0x55e   : > { %v1127_v54 = vpack.c.bf16 %v1126_v53, %v1126_v53 }
 0x560   : > { %1677 = vmatmul.msk.bf16.vlgmr.msrb.gmra.mxu3 %vm775_vm1, %v1127_v54 }
 0x5e3   : > { %v1156_v56 = vpop.f32.mrf.mxu3 }
 0x5e4   : > { %v1160_v57 = vadd.f32 %v1156_v56, %v2244_v3  ;;  %v1742_v3 = vld [vmem:[%s2220_s25] sm:$0xff] }
 0x5e5   : > { %1229 = vmatpush.bf16.msrb.mxu0 %v1742_v3 }
 0x5e6   : > { %v2317_v58 = vadd.f32 %v1850_v55, %v1160_v57 }
 0x5e8   : > { %v1168_v59 = vsel %vm775_vm1, %v2317_v58, 0.0 }
 0x5e9   : > { %1169 = vadd.xlane.f32.xlu1 %v1168_v59 }
 0x5eb   : > { %v1158_v60 = vpop.f32.mrf.mxu3 }
 0x65c   : > { %v1170_v61 = vpop.xlane.xlu1 %1169 }
 0x65d   : > { %v1171_v62 = vmul.f32 %v1170_v61, %v2248_v11 }
 0x65f   : > { %v1172_v63 = vsub.f32 %v2317_v58, %v1171_v62 }
 0x661   : > { %v1173_v0 = vmul.f32 %v1172_v63, %v1172_v63 }
 0x663   : > { %v1174_v1 = vsel %vm775_vm1, %v1173_v0, 0.0 }
 0x664   : > { %1175 = vadd.xlane.f32.xlu2 %v1174_v1 }
 0x6d7   : > { %v1176_v4 = vpop.xlane.xlu2 %1175 }
 0x6d8   : > { %v1177_v5 = vmul.f32 %v1176_v4, %v2248_v11 }
 0x6da   : > { %v1178_v6 = vadd.f32 1e-05, %v1177_v5 }
 0x6dc   : > { %1875 = vrsqrt.f32 %v1178_v6  ;;  %vm1185_vm11 = vweird.f32 %v1178_v6 }
 0x6e2   : > { %v1876_v7 = vpop.eup %1875 }
 0x6e3   : > { %v1180_v8 = vmul.f32 %v1876_v7, %v1178_v6  ;;  %vm1186_vm10 = vweird.f32 %v1876_v7 }
 0x6e4   : > { %vm1187_vm12 = vmor %vm1185_vm11, %vm1186_vm10 }
 0x6e5   : > { %v1181_v9 = vmul.f32 %v1876_v7, %v1180_v8 }
 0x6e7   : > { %v1182_v10 = vmul.f32 0.5, %v1181_v9 }
 0x6e9   : > { %v1183_v12 = vsub.f32 1.5, %v1182_v10 }
 0x6eb   : > { %v1184_v13 = vmul.f32 %v1876_v7, %v1183_v12 }
 0x6ed   : > { %v1188_v15 = vsel %vm1187_vm12, %v1876_v7, %v1184_v13 }
 0x6ee   : > { %v1189_v16 = vmul.f32 %v1188_v15, %v1172_v63 }
 0x6f0   : > { %v1193_v18 = vmul.f32 %v1851_v14, %v1189_v16 }
 0x6f2   : > { %v1197_v19 = vadd.f32 %v1852_v17, %v1193_v18 }
 0x6f4   : > { %v1198_v20 = vpack.c.bf16 %v1197_v19, %v1197_v19 }
 0x6f6   : > { %1686 = vmatmul.msk.bf16.vlgmr.msrb.gmra.mxu0 %vm775_vm1, %v1198_v20 }
 0x773   : > { %v1231_v30 = vpop.f32.mrf.mxu0 }
 0x774   : > { %v1232_v31 = vadd.f32 %v1853_v28, %v1231_v30 }
 0x776   : > { %v1687_v32 = vmul.f32 -1.702, %v1232_v31 }
 0x778   : > { %v1237_v33 = vmul.f32 1.442695, %v1687_v32 }
 0x77a   : > { %1877 = vpow2.f32 %v1237_v33 }
 0x77b   : > { %v1233_v34 = vpop.f32.mrf.mxu0 }
 0x780   : > { %v1878_v35 = vpop.eup %1877 }
 0x781   : > { %v1239_v36 = vadd.f32 1.0, %v1878_v35 }
 0x783   : > { %1879 = vrcp.f32 %v1239_v36  ;;  %v1251_v39 = vand.u32 2147483648, %v1239_v36  ;;  %v1249_v42 = vand.u32 2147483647, %v1239_v36  ;;  %vm1245_vm14 = vweird.f32 %v1239_v36 }
 0x785   : > { %v1252_v44 = vor.u32 1.1754944e-38, %v1251_v39  ;;  %vm1250_vm0 = vcmp.eq.f32.partialorder %v1249_v42, 8.507059e+37 }
 0x789   : > { %v1880_v37 = vpop.eup %1879 }
 0x78a   : > { %v1241_v38 = vmul.f32 %v1880_v37, %v1239_v36  ;;  %vm1246_vm13 = vweird.f32 %v1880_v37 }
 0x78b   : > { %vm1247_vm15 = vmor %vm1245_vm14, %vm1246_vm13 }
 0x78c   : > { %v1242_v40 = vsub.f32 1.0, %v1241_v38 }
 0x78e   : > { %v1243_v41 = vmul.f32 %v1880_v37, %v1242_v40 }
 0x790   : > { %v1244_v43 = vadd.f32 %v1880_v37, %v1243_v41 }
 0x792   : > { %v1248_v46 = vsel %vm1247_vm15, %v1880_v37, %v1244_v43 }
 0x793   : > { %v1253_v47 = vsel %vm1250_vm0, %v1252_v44, %v1248_v46 }
 0x794   : > { %v1255_v48 = vmul.f32 %v1253_v47, %v1232_v31 }
 0x796   : > { %v1256_v49 = vpack.c.bf16 %v1255_v48, %v1255_v48 }
 0x798   : > { %1329 = vmatmul.bf16.vlgmr.msra.gmra.mxu1 %v1256_v49 }
 0x815   : > { %v1330_v51 = vpop.f32.mrf.mxu1 }
 0x816   : > { %v1334_v52 = vadd.f32 %v1330_v51, %v2317_v58 }
 0x818   : > { %v1339_v53 = vadd.f32 %v1854_v50, %v1334_v52 }
 0x819   : > { %1344 = sbr.rel (%p1720_p1) target bundleno = 2611 (0xa33), region = 96 }
 0x81a   : > { %1340 = vst.msk [vmem:[#allocation2] sm:$0xff] %vm775_vm1, %v1339_v53 }
 0x81d   : > { %v1332_v54 = vpop.f32.mrf.mxu1 }
 0x81e   : > { %1368 = vmatpush.msra.mxu0 %v1339_v53  ;;  %v1346_v55 = vstv %s1345_s29  ;;  %v2004_v56 = vmov 0.0   ;;  %vm1375_vm3 = vcmask 253952   ;;  %v1752_v1 = vld [vmem:[%s2502_s17] sm:$0xff] }
 0x81f   : > { %vm1347_vm2 = vcmp.eq.s32.totalorder %v2280_v45, %v1346_v55  ;;  %v1753_v45 = vld [vmem:[%s2501_s0 + $0x8] sm:$0xff]  ;;  %v1373_v12 = vld [vmem:[%s2503_s23] sm:$0x1] }
 0x820   : > { %v1721_v57 = vsel %vm1347_vm2, 1.0, %v2004_v56  ;;  %1426 = vmatpush.bf16.msra.mxu1 %v1753_v45 }
 0x821   : > { %1722 = vmatmul.msk.f32.vlgmr.msra.gmra.mxu0 %vm859_vm6, %v1721_v57 }
 0x824   : > { %1427 = vmatpush.bf16.msra.mxu1 %v1752_v1 }
 0x89e   : > { %v1370_v59 = vpop.f32.mrf.mxu0 }
 0x89f   : > { %v1376_v58 = vsel %vm1375_vm3, %v1370_v59, 0.0 }
 0x8a0   : > { %1377 = vadd.xlane.f32.xlu0 %v1376_v58 }
 0x913   : > { %v1378_v60 = vpop.xlane.xlu0 %1377 }
 0x914   : > { %v1379_v61 = vmul.f32 %v1378_v60, %v2248_v11 }
 0x916   : > { %v1380_v62 = vsub.f32 %v1370_v59, %v1379_v61 }
 0x918   : > { %v1381_v63 = vmul.f32 %v1380_v62, %v1380_v62 }
 0x91a   : > { %v1382_v0 = vsel %vm1375_vm3, %v1381_v63, 0.0 }
 0x91b   : > { %1383 = vadd.xlane.f32.xlu0 %v1382_v0 }
 0x98e   : > { %v1384_v2 = vpop.xlane.xlu0 %1383 }
 0x98f   : > { %v1385_v3 = vmul.f32 %v1384_v2, %v2248_v11  ;;  %v1374_v11 = vld [vmem:[%s2504_s12] sm:$0x1] }
 0x991   : > { %v1386_v4 = vadd.f32 1e-05, %v1385_v3 }
 0x993   : > { %1881 = vrsqrt.f32 %v1386_v4  ;;  %vm1393_vm5 = vweird.f32 %v1386_v4 }
 0x999   : > { %v1882_v5 = vpop.eup %1881 }
 0x99a   : > { %v1388_v6 = vmul.f32 %v1882_v5, %v1386_v4  ;;  %vm1394_vm4 = vweird.f32 %v1882_v5 }
 0x99b   : > { %vm1395_vm6 = vmor %vm1393_vm5, %vm1394_vm4 }
 0x99c   : > { %v1389_v7 = vmul.f32 %v1882_v5, %v1388_v6 }
 0x99e   : > { %v1390_v8 = vmul.f32 0.5, %v1389_v7 }
 0x9a0   : > { %v1391_v9 = vsub.f32 1.5, %v1390_v8 }
 0x9a2   : > { %v1392_v10 = vmul.f32 %v1882_v5, %v1391_v9 }
 0x9a4   : > { %v1396_v13 = vsel %vm1395_vm6, %v1882_v5, %v1392_v10 }
 0x9a5   : > { %v1397_v14 = vmul.f32 %v1396_v13, %v1380_v62 }
 0x9a7   : > { %v1398_v15 = vmul.f32 %v1397_v14, %v1373_v12 }
 0x9a9   : > { %v1399_v16 = vadd.f32 %v1398_v15, %v1374_v11 }
 0x9ab   : > { %v1400_v17 = vpack.c.bf16 %v1399_v16, %v1399_v16 }
 0x9ad   : > { %1731 = vmatmul.msk.bf16.vlgmr.msra.gmra.mxu1 %vm775_vm1, %v1400_v17 }
 0xa2a   : > { %v1429_v18 = vpop.f32.mrf.mxu1 }
 0xa2b   : > { %1433 = vst.msk [vmem:[%s2238_s16] sm:$0x1] %vm1375_vm3, %v1429_v18 }
 0xa32   : > { %v1431_v19 = vpop.f32.mrf.mxu1 }
 0xa33 PF: > { %s2505_s15 = sld [smem:[#allocation11_spill]]  ;;  %s1445_s28 = sshll.u32 %s2238_s16, 4  ;;  %s1446_s28 = int_to_ptr.vmem [resolvable:$true] %s1445_s28 }
 0xa34   : > { %s2506_s18 = sld [smem:[#allocation31_spill]]  ;;  %s2508_s29 = sand.u32 1, %s1967_s19  }
 0xa35   : > { %s1435_s20 = scalar_lea.sflag [#allocation6], %s2508_s29 }
 0xa3a   : > { %s1443_s7 = scalar_lea.hbm %s2506_s18, %s2505_s15  ;;  %s1915_s2 = scalar_lea.hbm %s2506_s18, 2 }
 0xa3b   : > { %s1447_s24 = sshll.u32 %s1443_s7, 4  ;;  %s1448_s24 = int_to_ptr.hbm [resolvable:$true] %s1447_s24 }
 0xa3c   : > { %s1909_s22 = sshra.s32 %s1448_s24, 4  ;;  %s1910_s22 = int_to_ptr.hbm [resolvable:$true] %s1909_s22 }
 0xa3d   : > { %s1911_s0 = scalar_lea.hbm %s1910_s22, 1  ;;  %p1916_p6 = scmp.lt.s32.totalorder %s1910_s22, %s2506_s18 }
 0xa3e   : > { %p1912_p2 = scmp.ne.s32.totalorder %s1910_s22, %s1911_s0  ;;  %p1917_p7 = scmp.lt.s32.totalorder %s1915_s2, %s1911_s0 }
 0xa40   : > { %p1913_p4 = pnand %p1912_p2, %p2152_p3  ;;  %p1918_p8 = por %p1917_p7, %p1916_p6 }
 0xa42   : > { %p1914_p5 = pneg %p1913_p4 }
 0xa44   : > { %p1919_p10 = pnand %p1918_p8, %p1914_p5 }
 0xa46   : > { %1922 = shalt.err (!%p1919_p10)
}
 0xa47   : > { %1754 = dma.vmem_to_hbm [thread:$0]  (%p2152_p3), %s1446_s28, 16, %s1448_s24, %s1435_s20  }
 0xa48 PF: > { %s2509_s16 = sld [smem:[#allocation14_spill]] }
 0xa49   : > { %s2510_s25 = sld [smem:[#allocation9_spill]] }
 0xa4e   : > { %p1760_p11 = scmp.ge.s32.totalorder %s2509_s16, 2 }
 0xa4f   : > { %s1459_s12 = sand.u32 1, %s2510_s25  }
 0xa50   : > { %p1757_p12 = pnand %p1760_p11, %p2162_p9  ;;  %s1460_s15 = scalar_lea.sflag [#allocation6], %s1459_s12 }
 0xa52   : > { %p1758_p13 = pneg %p1757_p12 }
 0xa54   : > { %1958 = dma.done.wait (%p1758_p13), %s1460_s15, 16  }
 0xa55   : > { %1960 = vsyncadd (%p1758_p13), %s1460_s15, 4294967280  ;;  %s39_s12 = sadd.s32 1, %s2509_s16   ;;  %s2512_s4 = sld [smem:[#allocation10_spill]] }
 0xa56   : > { %p36_p0 = scmp.ge.s32.totalorder %s39_s12, 6   ;;  %s2513_s1 = sld [smem:[#allocation19_spill]] }
 0xa57   : > { %s2514_s20 = sld [smem:[#allocation12_spill]]  ;;  %s2518_s0 = smov %s1967_s19 }
 0xa58   : > { %s2515_s21 = sld [smem:[#allocation13_spill]]  ;;  %38 = sbr.rel (!%p36_p0) target bundleno = 28 (0x1c), region = 167 }
 0xa59   : > { %s2516_s22 = sld [smem:[#allocation15_spill]] }
 0xa5a   : > { %s2517_s2 = sld [smem:[#allocation17_spill]] }
 0xa5b   : > { %s2519_s19 = smov %s2512_s4 }
 0xa5d   :  { %1465 = vsyncpa [#allocation6], 1 }
 0xa5e   :  { %1467 = vsyncpa [#allocation6 + $0x1], 1 }

</bundles_post_ra>
